<compile_context>
chip_gen: v7x
topology: tpu7x:2x2x1
jax: 0.10.0
libtpu: 0.0.40
codegen_flags: <defaults>
</compile_context>

<pallas_src>
import jax
import jax.numpy as jnp
from jax.experimental import pallas as pl
from jax.experimental.pallas import tpu as pltpu


def _round_up(x, m):
    return ((x + m - 1) // m) * m


def critic_kernel(x_ref, w1_ref, b1_ref, w2_ref, b2_ref, w3_ref, b3_ref, o_ref):
    # Cast streamed activation tile to bf16 for the MXU (no-op if the producer
    # already supplies bf16 state); accumulation stays f32.
    x = x_ref[...].astype(jnp.bfloat16)

    # Layer 1: Linear(state_dim -> hidden) + ReLU  (bf16 MXU, f32 accumulate/VPU)
    h1 = jnp.dot(x, w1_ref[...], preferred_element_type=jnp.float32)
    h1 = jnp.maximum(h1 + b1_ref[...], 0.0)

    # Layer 2: Linear(hidden -> hidden) + ReLU
    h2 = jnp.dot(h1.astype(jnp.bfloat16), w2_ref[...],
                 preferred_element_type=jnp.float32)
    h2 = jnp.maximum(h2 + b2_ref[...], 0.0)

    # Layer 3: Linear(hidden -> 1) as VPU multiply + XLU lane reduction
    # (w3 is a (1, hidden) lane row broadcast over the tile).
    v = jnp.sum(h2 * w3_ref[...], axis=-1, keepdims=True) + b3_ref[...]
    o_ref[...] = v.astype(o_ref.dtype)


def critic_forward(state, params, tile_b=1024):
    """state: (B, state_dim) bf16 (preferred) or f32.
    params: w1,b1,w2,b2,w3,b3 with W stored as (in, out)."""
    B, S = state.shape
    H = params["w1"].shape[1]

    # Clamp the tile to the sublane-rounded batch (no point requesting a block far
    # larger than the array) and keep it a multiple of 8 so a partial last tile is
    # still a legal (8,128)-aligned block. No wrapper-side padding pass: the grid
    # simply covers B unevenly and the discarded tail rows are never written.
    tile_b = min(tile_b, _round_up(B, 8))
    tile_b = _round_up(tile_b, 8)
    nb = pl.cdiv(B, tile_b)

    # Weights cast once (in real training keep a bf16 copy of the params resident).
    w1 = params["w1"].astype(jnp.bfloat16)
    w2 = params["w2"].astype(jnp.bfloat16)
    b1 = params["b1"].reshape(1, H).astype(jnp.float32)
    b2 = params["b2"].reshape(1, H).astype(jnp.float32)
    w3 = params["w3"].reshape(1, H).astype(jnp.float32)   # head as a lane row
    b3 = params["b3"].reshape(1, 1).astype(jnp.float32)

    # Constant index_map -> block never changes -> DMA'd once, stays VMEM-resident.
    resident = lambda a: pl.BlockSpec(a.shape, lambda i: (0,) * a.ndim)

    out = pl.pallas_call(
        critic_kernel,
        out_shape=jax.ShapeDtypeStruct((B, 1), jnp.float32),
        grid=(nb,),
        in_specs=[
            pl.BlockSpec((tile_b, S), lambda i: (i, 0)),   # streamed, double-buffered
            resident(w1), resident(b1),
            resident(w2), resident(b2),
            resident(w3), resident(b3),
        ],
        out_specs=pl.BlockSpec((tile_b, 1), lambda i: (i, 0)),
        compiler_params=pltpu.CompilerParams(
            dimension_semantics=("parallel",),   # megacore-shard batch tiles on v7x
        ),
    )(state, w1, b1, w2, b2, w3, b3)
    return out


def init_params(key, state_dim, hidden_dim=128):
    """Deterministic init mimicking PyTorch nn.Linear default (U[-1/sqrt(fan_in), +])."""
    ks = jax.random.split(key, 6)

    def linear(kw, kb, fan_in, fan_out):
        bound = 1.0 / jnp.sqrt(jnp.float32(fan_in))
        w = jax.random.uniform(kw, (fan_in, fan_out), jnp.float32, -bound, bound)
        b = jax.random.uniform(kb, (1, fan_out), jnp.float32, -bound, bound)
        return w, b

    w1, b1 = linear(ks[0], ks[1], state_dim, hidden_dim)
    w2, b2 = linear(ks[2], ks[3], hidden_dim, hidden_dim)
    w3, b3 = linear(ks[4], ks[5], hidden_dim, 1)
    return dict(w1=w1, b1=b1, w2=w2, b2=b2, w3=w3, b3=b3)


def critic_reference(state, params):
    """Pure-JAX reference following the kernel's dtype path (bf16 MXU, f32 accumulate)."""
    xb = state.astype(jnp.bfloat16)
    w1 = params["w1"].astype(jnp.bfloat16)
    w2 = params["w2"].astype(jnp.bfloat16)
    h = jnp.maximum(jnp.dot(xb, w1, preferred_element_type=jnp.float32) + params["b1"], 0.0)
    h = jnp.maximum(jnp.dot(h.astype(jnp.bfloat16), w2, preferred_element_type=jnp.float32)
                    + params["b2"], 0.0)
    return h @ params["w3"] + params["b3"]


if __name__ == "__main__":
    key = jax.random.PRNGKey(0)
    k_param, k_state = jax.random.split(key)

    # Small shapes consistent with the module (hidden_dim=128 is the module default
    # and keeps full 128-lane utilization). batch=48 with tile_b=32 exercises the
    # multi-tile path AND the uneven (partial) last tile with no wrapper padding.
    batch, state_dim, hidden_dim = 48, 16, 128
    params = init_params(k_param, state_dim, hidden_dim)
    state = jax.random.normal(k_state, (batch, state_dim), jnp.float32)

    out = jax.block_until_ready(critic_forward(state, params, tile_b=32))

    ref = critic_reference(state, params)
    assert out.shape == (batch, 1), out.shape
    assert jnp.allclose(out, ref, atol=2e-2, rtol=2e-2), "mismatch vs reference"

    print("KERNEL_OK")
</pallas_src>

<mosaic_0001>
module attributes {stable_mosaic.version = 11 : i64} {
  func.func @critic_kernel(%arg0: i32, %arg1: memref<32x16xf32, #tpu.memory_space<vmem>>, %arg2: memref<16x128xbf16, #tpu.memory_space<vmem>>, %arg3: memref<1x128xf32, #tpu.memory_space<vmem>>, %arg4: memref<128x128xbf16, #tpu.memory_space<vmem>>, %arg5: memref<1x128xf32, #tpu.memory_space<vmem>>, %arg6: memref<1x128xf32, #tpu.memory_space<vmem>>, %arg7: memref<1x1xf32, #tpu.memory_space<vmem>>, %arg8: memref<32x1xf32, #tpu.memory_space<vmem>>) attributes {dimension_semantics = [#tpu.dimension_semantics<parallel>], iteration_bounds = array<i64: 2>, scalar_prefetch = 0 : i64, scratch_operands = 0 : i64, tpu.core_type = #tpu.core_type<tc>, window_params = [{transform_indices = @transform_0, window_bounds = array<i64: 32, 16>}, {pipeline_mode = #tpu.pipeline_mode<synchronous>, transform_indices = @transform_1, window_bounds = array<i64: 16, 128>}, {pipeline_mode = #tpu.pipeline_mode<synchronous>, transform_indices = @transform_2, window_bounds = array<i64: 1, 128>}, {pipeline_mode = #tpu.pipeline_mode<synchronous>, transform_indices = @transform_3, window_bounds = array<i64: 128, 128>}, {pipeline_mode = #tpu.pipeline_mode<synchronous>, transform_indices = @transform_4, window_bounds = array<i64: 1, 128>}, {pipeline_mode = #tpu.pipeline_mode<synchronous>, transform_indices = @transform_5, window_bounds = array<i64: 1, 128>}, {pipeline_mode = #tpu.pipeline_mode<synchronous>, transform_indices = @transform_6, window_bounds = array<i64: 1, 1>}, {transform_indices = @transform_7, window_bounds = array<i64: 32, 1>}]} {
    %c0 = arith.constant 0 : index
    %c0_0 = arith.constant 0 : index
    %0 = vector.load %arg1[%c0, %c0_0] : memref<32x16xf32, #tpu.memory_space<vmem>>, vector<32x16xf32>
    %1 = arith.truncf %0 : vector<32x16xf32> to vector<32x16xbf16>
    %c0_1 = arith.constant 0 : index
    %c0_2 = arith.constant 0 : index
    %2 = vector.load %arg2[%c0_1, %c0_2] : memref<16x128xbf16, #tpu.memory_space<vmem>>, vector<16x128xbf16>
    %cst = arith.constant dense<0.000000e+00> : vector<32x128xf32>
    %3 = tpu.matmul %1, %2, %cst {dimension_numbers = #tpu.dot_dimension_numbers<[1], [0], [0], [1], [0, 0, 1, 1], [], []>} : vector<32x16xbf16>, vector<16x128xbf16>, vector<32x128xf32> -> vector<32x128xf32>
    %c0_3 = arith.constant 0 : index
    %c0_4 = arith.constant 0 : index
    %4 = vector.load %arg3[%c0_3, %c0_4] : memref<1x128xf32, #tpu.memory_space<vmem>>, vector<1x128xf32>
    %5 = vector.broadcast %4 : vector<1x128xf32> to vector<32x128xf32>
    %6 = arith.addf %3, %5 : vector<32x128xf32>
    %cst_5 = arith.constant 0.000000e+00 : f32
    %7 = vector.broadcast %cst_5 : f32 to vector<32x128xf32>
    %8 = arith.maximumf %6, %7 : vector<32x128xf32>
    %9 = arith.truncf %8 : vector<32x128xf32> to vector<32x128xbf16>
    %c0_6 = arith.constant 0 : index
    %c0_7 = arith.constant 0 : index
    %10 = vector.load %arg4[%c0_6, %c0_7] : memref<128x128xbf16, #tpu.memory_space<vmem>>, vector<128x128xbf16>
    %cst_8 = arith.constant dense<0.000000e+00> : vector<32x128xf32>
    %11 = tpu.matmul %9, %10, %cst_8 {dimension_numbers = #tpu.dot_dimension_numbers<[1], [0], [0], [1], [0, 0, 1, 1], [], []>} : vector<32x128xbf16>, vector<128x128xbf16>, vector<32x128xf32> -> vector<32x128xf32>
    %c0_9 = arith.constant 0 : index
    %c0_10 = arith.constant 0 : index
    %12 = vector.load %arg5[%c0_9, %c0_10] : memref<1x128xf32, #tpu.memory_space<vmem>>, vector<1x128xf32>
    %13 = vector.broadcast %12 : vector<1x128xf32> to vector<32x128xf32>
    %14 = arith.addf %11, %13 : vector<32x128xf32>
    %cst_11 = arith.constant 0.000000e+00 : f32
    %15 = vector.broadcast %cst_11 : f32 to vector<32x128xf32>
    %16 = arith.maximumf %14, %15 : vector<32x128xf32>
    %c0_12 = arith.constant 0 : index
    %c0_13 = arith.constant 0 : index
    %17 = vector.load %arg6[%c0_12, %c0_13] : memref<1x128xf32, #tpu.memory_space<vmem>>, vector<1x128xf32>
    %18 = vector.broadcast %17 : vector<1x128xf32> to vector<32x128xf32>
    %19 = arith.mulf %16, %18 : vector<32x128xf32>
    %cst_14 = arith.constant dense<0.000000e+00> : vector<32xf32>
    %20 = vector.multi_reduction <add>, %19, %cst_14 [1] : vector<32x128xf32> to vector<32xf32>
    %21 = vector.shape_cast %20 : vector<32xf32> to vector<32x1xf32>
    %c0_15 = arith.constant 0 : index
    %c0_16 = arith.constant 0 : index
    %22 = vector.load %arg7[%c0_15, %c0_16] : memref<1x1xf32, #tpu.memory_space<vmem>>, vector<1x1xf32>
    %23 = vector.broadcast %22 : vector<1x1xf32> to vector<32x1xf32>
    %24 = arith.addf %21, %23 : vector<32x1xf32>
    %c0_17 = arith.constant 0 : index
    %c0_18 = arith.constant 0 : index
    %25 = vector.load %arg8[%c0_17, %c0_18] : memref<32x1xf32, #tpu.memory_space<vmem>>, vector<32x1xf32>
    tpu.vector_store %arg8[%c0_17, %c0_18], %24 {strides = array<i32>} : memref<32x1xf32, #tpu.memory_space<vmem>>, vector<32x1xf32>,
    return
  }
  func.func @transform_0(%arg0: i32) -> (i32, i32) {
    %c0_i32 = arith.constant 0 : i32
    %c0_i32_0 = arith.constant 0 : i32
    return %arg0, %c0_i32 : i32, i32
  }
  func.func @transform_1(%arg0: i32) -> (i32, i32) {
    %c0_i32 = arith.constant 0 : i32
    %c0_i32_0 = arith.constant 0 : i32
    %c0_i32_1 = arith.constant 0 : i32
    return %c0_i32, %c0_i32_0 : i32, i32
  }
  func.func @transform_2(%arg0: i32) -> (i32, i32) {
    %c0_i32 = arith.constant 0 : i32
    %c0_i32_0 = arith.constant 0 : i32
    %c0_i32_1 = arith.constant 0 : i32
    return %c0_i32, %c0_i32_0 : i32, i32
  }
  func.func @transform_3(%arg0: i32) -> (i32, i32) {
    %c0_i32 = arith.constant 0 : i32
    %c0_i32_0 = arith.constant 0 : i32
    %c0_i32_1 = arith.constant 0 : i32
    return %c0_i32, %c0_i32_0 : i32, i32
  }
  func.func @transform_4(%arg0: i32) -> (i32, i32) {
    %c0_i32 = arith.constant 0 : i32
    %c0_i32_0 = arith.constant 0 : i32
    %c0_i32_1 = arith.constant 0 : i32
    return %c0_i32, %c0_i32_0 : i32, i32
  }
  func.func @transform_5(%arg0: i32) -> (i32, i32) {
    %c0_i32 = arith.constant 0 : i32
    %c0_i32_0 = arith.constant 0 : i32
    %c0_i32_1 = arith.constant 0 : i32
    return %c0_i32, %c0_i32_0 : i32, i32
  }
  func.func @transform_6(%arg0: i32) -> (i32, i32) {
    %c0_i32 = arith.constant 0 : i32
    %c0_i32_0 = arith.constant 0 : i32
    %c0_i32_1 = arith.constant 0 : i32
    return %c0_i32, %c0_i32_0 : i32, i32
  }
  func.func @transform_7(%arg0: i32) -> (i32, i32) {
    %c0_i32 = arith.constant 0 : i32
    %c0_i32_0 = arith.constant 0 : i32
    return %arg0, %c0_i32 : i32, i32
  }
}

</mosaic_0001>

<bundles_post_ra>
// kernel: tpu_custom_call.1
= control target key start
LH: loop header
LB: loop body
LE: loop exit
PB: predicated region body
PF: predicated region fallthrough
CT: control target
= control target key end

     0   :  { %s1217_s0 = inlined_call_operand.vmem [shape: f32[48,16], index: 0, kind: input, shape index: {}]   ;;  %s1218_s1 = inlined_call_operand.vmem [shape: bf16[16,128], index: 1, kind: input, shape index: {}]   ;;  %s1219_s2 = inlined_call_operand.vmem [shape: f32[1,128], index: 2, kind: input, shape index: {}]   ;;  %s1220_s3 = inlined_call_operand.vmem [shape: bf16[128,128], index: 3, kind: input, shape index: {}]   ;;  %s1221_s4 = inlined_call_operand.vmem [shape: f32[1,128], index: 4, kind: input, shape index: {}]   ;;  %s1222_s5 = inlined_call_operand.vmem [shape: f32[1,128], index: 5, kind: input, shape index: {}]   ;;  %s1223_s6 = inlined_call_operand.<no memory space> [shape: f32[1,1], index: 6, kind: input, shape index: {}]   ;;  %s1224_s7 = inlined_call_operand.vmem [shape: f32[48,1], index: 7, kind: output, shape index: {}]  }
   0x1   :  { %v12_v0 = vstv %s1223_s6 }
   0x2   :  { %13 = vst [vmem:[#allocation2] sm:$0x1] %v12_v0 }
   0x3   :  { %s1081_s26 = smov 0   ;;  %s1083_s27 = smov 0  }
   0x4   :  { %s1085_s28 = smov 0  }
   0x5 LB: > { %s1094_s6 = sadd.s32 4294967295, %s1004_s28   ;;  %s1096_s29 = sadd.s32 1, %s1004_s28   ;;  %s1004_s28 = sphi %s1085_s28, %s1231_s28   ;;  %s1000_s27 = sphi %s1083_s27, %s1230_s27   ;;  %s996_s26 = sphi %s1081_s26, %s1229_s26  }
   0x6   : > { %s175_s30 = ssub.s32 %s1004_s28, %s1096_s29  ;;  %s178_s8 = sadd.s32 1, %s1000_s27 }
   0x7   : > { %p176_p0 = scmp.eq.s32.totalorder %s175_s30, 0  ;;  %p188_p1 = scmp.ne.s32.totalorder %s1000_s27, %s996_s26 }
   0x8   : > { %p189_p2 = scmp.eq.s32.totalorder %s1094_s6, 1  ;;  %p775_p3 = scmp.ge.s32.totalorder %s1004_s28, 1 }
   0x9   : > { %s1104_s9 = scalar_select %p176_p0, %s1000_s27, %s178_s8  }
   0xa   : > { %p1106_p4 = por %p189_p2, %p188_p1  ;;  %p248_p5 = scmp.lt.s32.totalorder %s1004_s28, 3 }
   0xc   : > { %p249_p6 = pnand %p775_p3, %p248_p5 }
   0xd   : > { %v941_v1 = vld [vmem:[%s1218_s1] sm:$0xff] (!%p249_p6)   ;;  %s1114_s13 = sshll.u32 (!%p249_p6), %s1094_s6, 2  ;;  %v943_v3 = vld [vmem:[%s1220_s3 + $0x8] sm:$0xff] (!%p249_p6)   ;;  %v944_v4 = vld [vmem:[%s1220_s3 + $0x10] sm:$0xff] (!%p249_p6)   ;;  %vm324_vm0 = vcmask (!%p249_p6), 130048   ;;  %s280_s24 = sand.u32 (!%p249_p6), 1, %s996_s26  }
   0xe   : > { %252 = sbr.rel (%p249_p6) target bundleno = 668 (0x29c), region = 48  ;;  %p288_p7 = scmp.lt.s32.totalorder (!%p249_p6), %s1114_s13, 5  ;;  %827 = vmatprep.subr.bf16.mxu0 (!%p249_p6), %v941_v1  ;;  %v942_v2 = vld [vmem:[%s1220_s3] sm:$0xff] (!%p249_p6)   ;;  %v945_v11 = vld [vmem:[%s1220_s3 + $0x18] sm:$0xff] (!%p249_p6)   ;;  %v947_v13 = vld [vmem:[%s1220_s3 + $0x28] sm:$0xff] (!%p249_p6)   ;;  %vm540_vm1 = vcmask (!%p249_p6), 7168  }
   0xf   : > { %828 = vmatpush3.bf16.msra.mxu0 (!%p249_p6), %v941_v1  ;;  %833 = vmatprep.subr.bf16.mxu1 (!%p249_p6), %v942_v2  ;;  %v946_v12 = vld [vmem:[%s1220_s3 + $0x20] sm:$0xff] (!%p249_p6)   ;;  %v948_v14 = vld [vmem:[%s1220_s3 + $0x30] sm:$0xff] (!%p249_p6)   ;;  %v949_v15 = vld [vmem:[%s1220_s3 + $0x38] sm:$0xff] (!%p249_p6)   ;;  %s776_s25 = sshll.u32 (!%p249_p6), %s280_s24, 5 }
  0x10   : > { %834 = vmatpush3.bf16.msra.mxu1 (!%p249_p6), %v942_v2  ;;  %v779_v16 = vld [vmem:[%s1219_s2] ss:$0 sm:$0xff] (!%p249_p6)  ;;  %s1155_s28 = scalar_lea.vmem (!%p249_p6), [#allocation3], %s776_s25  }
  0x11   : > { %835 = vmatprep.subr.bf16.mxu1 (!%p249_p6), %v943_v3  ;;  %v783_v31 = vld [vmem:[%s1221_s4] ss:$0 sm:$0xff] (!%p249_p6) }
  0x12   : > { %v792_v37 = vld [vmem:[%s1222_s5] ss:$0 sm:$0xff] (!%p249_p6) }
  0x13   : > { %v793_v49 = vld [vmem:[#allocation2] ss:$0 sm:$0xff] (!%p249_p6) }
  0x14   : > { %836 = vmatpush3.bf16.msra.mxu1 (!%p249_p6), %v943_v3 }
  0x15   : > { %s289_s16 = scalar_select %p288_p7, %s1114_s13, 5  ;;  %837 = vmatprep.subr.bf16.mxu1 %v944_v4 }
  0x16   : > { %s553_s26 = ssub.s32 (%p1106_p4), 6, %s1114_s13  ;;  %s811_s30 = sshll.u32 (%p1106_p4), %s1094_s6, 5 }
  0x17   : > { %s778_s19 = sshll.u32 %s289_s16, 3  ;;  %p554_p8 = scmp.lt.s32.totalorder (%p1106_p4), %s553_s26, 4 }
  0x18   : > { %s291_s22 = scalar_lea.vmem %s1217_s0, %s778_s19  ;;  %838 = vmatpush3.bf16.msra.mxu1 %v944_v4  ;;  %s1168_s12 = scalar_lea.vmem (%p1106_p4), %s1224_s7, %s811_s30  }
  0x19   : > { %v303_v5 = vld [vmem:[%s291_s22] sm:$0xff]  ;;  %v304_v6 = vld [vmem:[%s291_s22 + $0x8] sm:$0xff]  ;;  %v305_v7 = vld [vmem:[%s291_s22 + $0x10] sm:$0xff]  ;;  %839 = vmatprep.subr.bf16.mxu1 %v945_v11 }
  0x1a   : > { %v307_v8 = vpack.c.bf16 %v304_v6, %v303_v5  ;;  %v306_v9 = vld [vmem:[%s291_s22 + $0x18] sm:$0xff] }
  0x1b   : > { %v308_v10 = vpack.c.bf16 %v306_v9, %v305_v7 }
  0x1c   : > { %829 = vmatprep.mubr.msk.bf16.mxu0 %vm324_vm0, %v307_v8  ;;  %840 = vmatpush3.bf16.msra.mxu1 %v945_v11 }
  0x1d   : > { %830 = vmatmul.mubr.msk.bf16.vlgmr.msra.gmra.mrb[0].mxu0 %vm324_vm0, %v308_v10  ;;  %841 = vmatprep.subr.bf16.mxu1 %v946_v12 }
  0x20   : > { %842 = vmatpush3.bf16.msra.mxu1 %v946_v12 }
  0x21   : > { %843 = vmatprep.subr.bf16.mxu1 %v947_v13 }
  0x24   : > { %844 = vmatpush3.bf16.msra.mxu1 %v947_v13 }
  0x25   : > { %845 = vmatprep.subr.bf16.mxu1 %v948_v14 }
  0x28   : > { %846 = vmatpush3.bf16.msra.mxu1 %v948_v14 }
  0x29   : > { %847 = vmatprep.subr.bf16.mxu1 %v949_v15 }
  0x2c   : > { %848 = vmatpush3.bf16.msra.mxu1 %v949_v15 }
  0xf0   : > { %v831_v17 = vpop.f32.mrb[0].mxu0 }
  0xf1   : > { %v374_v18 = vadd.f32 %v831_v17, %v779_v16  ;;  %v365_v19 = vpop.f32.mrb[1].mxu0 }
  0xf2   : > { %v366_v20 = vadd.f32 %v779_v16, %v365_v19  ;;  %v832_v21 = vpop.f32.mrb[2].mxu0 }
  0xf3   : > { %v377_v22 = vadd.f32 %v832_v21, %v779_v16  ;;  %v368_v23 = vpop.f32.mrb[3].mxu0  ;;  %v382_v25 = vmax.f32 %v374_v18, 0.0 }
  0xf4   : > { %v369_v24 = vadd.f32 %v779_v16, %v368_v23  ;;  %v380_v27 = vmax.f32 %v366_v20, 0.0 }
  0xf5   : > { %v383_v26 = vmax.f32 %v377_v22, 0.0 }
  0xf6   : > { %v381_v28 = vmax.f32 %v369_v24, 0.0 }
  0xf7   : > { %v385_v29 = vpack.c.bf16 %v383_v26, %v382_v25 }
  0xf8   : > { %v384_v30 = vpack.c.bf16 %v381_v28, %v380_v27 }
  0xfa   : > { %849 = vmatprep.mubr.bf16.mxu1 %v384_v30 }
  0xfb   : > { %850 = vmatmul.mubr.bf16.vlgmr.msra.gmra.mrb[0].mxu1 %v385_v29 }
 0x1ce   : > { %v851_v32 = vpop.f32.mrb[0].mxu1 }
 0x1cf   : > { %v500_v33 = vadd.f32 %v851_v32, %v783_v31  ;;  %v491_v34 = vpop.f32.mrb[1].mxu1 }
 0x1d0   : > { %v492_v35 = vadd.f32 %v783_v31, %v491_v34  ;;  %v852_v36 = vpop.f32.mrb[2].mxu1 }
 0x1d1   : > { %v508_v38 = vmax.f32 %v500_v33, 0.0  ;;  %v503_v39 = vadd.f32 %v852_v36, %v783_v31  ;;  %v494_v40 = vpop.f32.mrb[3].mxu1 }
 0x1d2   : > { %v506_v41 = vmax.f32 %v492_v35, 0.0  ;;  %v495_v42 = vadd.f32 %v783_v31, %v494_v40 }
 0x1d3   : > { %v509_v43 = vmax.f32 %v503_v39, 0.0  ;;  %v519_v44 = vmul.f32 %v792_v37, %v508_v38 }
 0x1d4   : > { %v507_v45 = vmax.f32 %v495_v42, 0.0  ;;  %v517_v46 = vmul.f32 %v792_v37, %v506_v41 }
 0x1d5   : > { %525 = vadd.xlane.f32.xlu1 %v519_v44  ;;  %v520_v47 = vmul.f32 %v792_v37, %v509_v43 }
 0x1d6   : > { %521 = vadd.xlane.f32.xlu0 %v517_v46  ;;  %v518_v48 = vmul.f32 %v792_v37, %v507_v45 }
 0x1d9   : > { %527 = vadd.xlane.f32.xlu1 %v520_v47 }
 0x1da   : > { %523 = vadd.xlane.f32.xlu0 %v518_v48 }
 0x262   : > { %v526_v50 = vpop.xlane.xlu1 %525 }
 0x263   : > { %v538_v51 = vadd.f32 %v793_v49, %v526_v50  ;;  %v522_v52 = vpop.xlane.xlu0 %521 }
 0x264   : > { %v536_v53 = vadd.f32 %v793_v49, %v522_v52  ;;  %551 = sbr.rel (!%p1106_p4) target bundleno = 668 (0x29c), region = 52 }
 0x265   : > { %543 = vst.msk [vmem:[%s1155_s28 + $0x10] sm:$0xff] %vm540_vm1, %v538_v51 }
 0x266   : > { %541 = vst.msk [vmem:[%s1155_s28] sm:$0xff] %vm540_vm1, %v536_v53  ;;  %v528_v54 = vpop.xlane.xlu1 %527 }
 0x267   : > { %v539_v55 = vadd.f32 %v793_v49, %v528_v54  ;;  %v524_v56 = vpop.xlane.xlu0 %523 }
 0x268   : > { %v537_v57 = vadd.f32 %v793_v49, %v524_v56 }
 0x269   : > { %544 = vst.msk [vmem:[%s1155_s28 + $0x18] sm:$0xff] %vm540_vm1, %v539_v55 }
 0x26a   : > { %542 = vst.msk [vmem:[%s1155_s28 + $0x8] sm:$0xff] %vm540_vm1, %v537_v57 }
 0x26b   : > { %s1233_s26 = smov (!%p554_p8, %s553_s26), 4 }
 0x26c   : > { %s796_s14 = sshll.u32 %s1233_s26, 7 }
 0x26d   : > { %p799_p9 = scmp.eq.s32.totalorder %s796_s14, 0 }
 0x26e   : > { %s1174_s15 = sshrl.u32 (!%p799_p9), %s1233_s26, 2 }
 0x26f   : > { %562 = sbr.rel (%p799_p9) target bundleno = 668 (0x29c), region = 56  ;;  %p800_p10 = scmp.le.s32.totalorder (!%p799_p9), %s1174_s15, 0 }
 0x276   : > { %728 = sbr.rel (%p800_p10) target bundleno = 647 (0x287), region = 132  ;;  %s1226_s6 = smov (!%p800_p10), %s1168_s12 }
 0x277   : > { %s1227_s10 = smov (!%p800_p10), %s1155_s28  ;;  %s1183_s13 = smov (!%p800_p10), 0  }
 0x278   : > { %s1018_s16 = smov (!%p800_p10), 0  }
 0x27d LB: >> { %v630_v58 = vld [vmem:[%s1012_s10] sm:$0xff]  ;;  %v632_v59 = vld [vmem:[%s1012_s10 + $0x8] sm:$0xff]  ;;  %v634_v60 = vld [vmem:[%s1012_s10 + $0x10] sm:$0xff]  ;;  %s638_s17 = sadd.s32 1, %s1016_s13  ;;  %s624_s16 = sadd.s32 1, %s1020_s16   ;;  %s1020_s16 = sphi %s1018_s16, %s624_s16   ;;  %s1016_s13 = sphi %s1183_s13, %s1228_s13   ;;  %s1012_s10 = sphi %s1227_s10, %s643_s10   ;;  %s1008_s6 = sphi %s1226_s6, %s644_s6  }
 0x27e   : >> { %631 = vst [vmem:[%s1008_s6] sm:$0xff] %v630_v58  ;;  %633 = vst [vmem:[%s1008_s6 + $0x8] sm:$0xff] %v632_v59  ;;  %v636_v61 = vld [vmem:[%s1012_s10 + $0x18] sm:$0xff]  ;;  %p639_p11 = scmp.ge.s32.totalorder %s638_s17, %s1174_s15  ;;  %p623_p12 = scmp.ge.s32.totalorder %s624_s16, %s1174_s15 }
 0x27f   : >> { %635 = vst [vmem:[%s1008_s6 + $0x10] sm:$0xff] %v634_v60  ;;  %637 = vst [vmem:[%s1008_s6 + $0x18] sm:$0xff] %v636_v61 }
 0x280   : >> { %s1235_s17 = smov (%p639_p11, %s638_s17), 0  ;;  %626 = sbr.rel (!%p623_p12) target bundleno = 637 (0x27d), region = 138 }
 0x281   : >> { %s801_s18 = sshll.u32 %s1235_s17, 5  ;;  %s1228_s13 = smov %s1235_s17 }
 0x282   : >> { %s643_s10 = scalar_lea.vmem %s1155_s28, %s801_s18 [#allocation3]   ;;  %s644_s6 = scalar_lea.vmem %s1168_s12, %s801_s18  }
 0x287 PF: > { %s1199_s19 = sand.u32 3, %s1233_s26   ;;  %s812_s20 = sshll.u32 %s1174_s15, 5 }
 0x288   : > { %s649_s21 = scalar_lea.vmem %s1155_s28, %s812_s20 [#allocation3]   ;;  %s651_s22 = scalar_lea.vmem %s1168_s12, %s812_s20  }
 0x289   : > { %p806_p13 = scmp.le.s32.totalorder %s1199_s19, 0 }
 0x28a   : > { %s1022_s23 = smov (!%p806_p13), %s651_s22   ;;  %s1026_s24 = smov (!%p806_p13), %s649_s21  }
 0x28b   : > { %742 = sbr.rel (%p806_p13) target bundleno = 668 (0x29c), region = 143  ;;  %s1030_s25 = smov (!%p806_p13), 0  }
 0x28c   : > { %s1034_s30 = smov (!%p806_p13), 0  }
 0x292 LB: >> { %v661_v62 = vld [vmem:[%s1028_s24] sm:$0xff]  ;;  %s663_s26 = sadd.s32 1, %s1032_s25  ;;  %s655_s30 = sadd.s32 1, %s1036_s30   ;;  %s1036_s30 = sphi %s1034_s30, %s655_s30   ;;  %s1032_s25 = sphi %s1030_s25, %s1031_s25   ;;  %s1028_s24 = sphi %s1026_s24, %s668_s24   ;;  %s1024_s23 = sphi %s1022_s23, %s669_s23  }
 0x293   : >> { %662 = vst [vmem:[%s1024_s23] sm:$0xff] %v661_v62  ;;  %p664_p0 = scmp.ge.s32.totalorder %s663_s26, %s1199_s19  ;;  %p654_p1 = scmp.ge.s32.totalorder %s655_s30, %s1199_s19 }
 0x295   : >> { %s1237_s26 = smov (%p664_p0, %s663_s26), 0  ;;  %657 = sbr.rel (!%p654_p1) target bundleno = 658 (0x292), region = 149 }
 0x296   : >> { %s807_s28 = sshll.u32 %s1237_s26, 3  ;;  %s1031_s25 = smov %s1237_s26  }
 0x297   : >> { %s668_s24 = scalar_lea.vmem %s649_s21, %s807_s28 [#allocation3]   ;;  %s669_s23 = scalar_lea.vmem %s651_s22, %s807_s28  }
 0x29c PF: > { %p16_p2 = scmp.ge.s32.totalorder %s1096_s29, 4   ;;  %s1229_s26 = smov %s1000_s27 }
 0x29d   : > { %s1230_s27 = smov %s1104_s9  ;;  %s1231_s28 = smov %s1096_s29 }
 0x29e   :  { %18 = sbr.rel (!%p16_p2) target bundleno = 5 (0x5), region = 160 }

</bundles_post_ra>
